<compile_context>
chip_gen: v7x
topology: tpu7x:2x2x1
jax: 0.10.0
libtpu: 0.0.40
codegen_flags: <defaults>
</compile_context>

<pallas_src>
import math

import jax
import jax.numpy as jnp
from jax.experimental import pallas as pl
from jax.experimental.pallas import tpu as pltpu


def _max_pool_kernel(x_ref, o_ref):
    """x_ref: (ts, M, fn) block of the reduce axis; o_ref: (M, fn) accumulator."""
    partial = jnp.max(x_ref[...], axis=0)            # elementwise max over sublane tiles

    @pl.when(pl.program_id(1) == 0)                   # first reduce step: init
    def _():
        o_ref[...] = partial

    @pl.when(pl.program_id(1) > 0)                    # later steps: running max
    def _():
        o_ref[...] = jnp.maximum(o_ref[...], partial)


def _choose_feature_tile(n):
    """Largest lane-dense (multiple-of-128) tile <= 2048 that divides n; else full n."""
    if n % 128 != 0:
        return n
    fn = min(n, 2048)
    while n % fn != 0:
        fn -= 128
    return fn


def _choose_reduce_tile(s, m, fn, itemsize, budget_bytes=8 * 1024 * 1024):
    """Biggest reduce-axis tile whose double-buffered input block fits the budget."""
    per_slice = max(1, m * fn * itemsize)
    return max(1, min(s, budget_bytes // (2 * per_slice)))


def _max_pool_axis0_3d(x):
    """Max over axis 0 of a (S, M, N) array via Pallas; returns (M, N)."""
    S, M, N = x.shape
    dtype = x.dtype

    fn = _choose_feature_tile(N)
    ts = _choose_reduce_tile(S, M, fn, dtype.itemsize)

    # Pad the reduce axis with the max-identity so every block is full (no tail masking).
    s_pad = pl.cdiv(S, ts) * ts
    if s_pad != S:
        if jnp.issubdtype(dtype, jnp.floating):
            fill = jnp.array(-jnp.inf, dtype)
        else:
            fill = jnp.array(jnp.iinfo(dtype).min, dtype)
        x = jnp.concatenate([x, jnp.full((s_pad - S, M, N), fill, dtype)], axis=0)

    n_feat = N // fn
    n_red = s_pad // ts

    return pl.pallas_call(
        _max_pool_kernel,
        out_shape=jax.ShapeDtypeStruct((M, N), dtype),
        grid=(n_feat, n_red),                                     # reduce axis last
        in_specs=[pl.BlockSpec((ts, M, fn), lambda f, r: (r, 0, f))],
        out_specs=pl.BlockSpec((M, fn), lambda f, r: (0, f)),     # resident across r
        compiler_params=pltpu.CompilerParams(
            dimension_semantics=("parallel", "arbitrary")),
    )(x)


def featurewise_max_pool(x, axis):
    """torch.max(x, axis)[0] equivalent (values only), any rank / any axis."""
    axis = axis % x.ndim

    # Layout glue (XLA, one-time): reduce axis to the front, remaining dims to 2D
    # keeping the original trailing axis as the lane (last) dim.
    xm = jnp.moveaxis(x, axis, 0)
    red = xm.shape[0]
    rest = xm.shape[1:]
    if len(rest) == 0:
        xm3 = xm.reshape(red, 1, 1)
    elif len(rest) == 1:
        xm3 = xm.reshape(red, 1, rest[0])
    else:
        xm3 = xm.reshape(red, math.prod(rest[:-1]), rest[-1])

    out2d = _max_pool_axis0_3d(xm3)
    return out2d.reshape(rest)


if __name__ == "__main__":
    key = jax.random.PRNGKey(0)

    # Canonical RelationalNetworks usage: FeaturewiseMaxPool(pixel_axis=0) applied to
    # the (n_pixels, batch, n_features) output of the relational module.
    n_pixels, batch, n_features = 16 * 16, 2, 128
    x = jax.random.normal(key, (n_pixels, batch, n_features), dtype=jnp.float32)

    out = featurewise_max_pool(x, axis=0)
    out = jax.block_until_ready(out)

    assert out.shape == (batch, n_features), out.shape
    ref = jnp.max(x, axis=0)
    assert bool(jnp.array_equal(out, ref)), float(jnp.abs(out - ref).max())

    print("KERNEL_OK")
</pallas_src>

<mosaic_0001>
module attributes {stable_mosaic.version = 11 : i64} {
  func.func @_max_pool_kernel(%arg0: i32, %arg1: i32, %arg2: memref<256x2x128xf32, #tpu.memory_space<vmem>>, %arg3: memref<2x128xf32, #tpu.memory_space<vmem>>) attributes {dimension_semantics = [#tpu.dimension_semantics<parallel>, #tpu.dimension_semantics<arbitrary>], iteration_bounds = array<i64: 1, 1>, scalar_prefetch = 0 : i64, scratch_operands = 0 : i64, tpu.core_type = #tpu.core_type<tc>, window_params = [{transform_indices = @transform_0, window_bounds = array<i64: 256, 2, 128>}, {transform_indices = @transform_1, window_bounds = array<i64: 2, 128>}]} {
    %c0 = arith.constant 0 : index
    %c0_0 = arith.constant 0 : index
    %c0_1 = arith.constant 0 : index
    %0 = vector.load %arg2[%c0, %c0_0, %c0_1] : memref<256x2x128xf32, #tpu.memory_space<vmem>>, vector<256x2x128xf32>
    %cst = arith.constant dense<0xFF800000> : vector<2x128xf32>
    %1 = vector.multi_reduction <maximumf>, %0, %cst [0] : vector<256x2x128xf32> to vector<2x128xf32>
    %c0_i32 = arith.constant 0 : i32
    %2 = arith.cmpi eq, %arg1, %c0_i32 : i32
    %3 = arith.extui %2 : i1 to i32
    %c0_i32_2 = arith.constant 0 : i32
    %4 = arith.cmpi ne, %3, %c0_i32_2 : i32
    scf.if %4 {
      %c0_5 = arith.constant 0 : index
      %c0_6 = arith.constant 0 : index
      %8 = vector.load %arg3[%c0_5, %c0_6] : memref<2x128xf32, #tpu.memory_space<vmem>>, vector<2x128xf32>
      tpu.vector_store %arg3[%c0_5, %c0_6], %1 {strides = array<i32>} : memref<2x128xf32, #tpu.memory_space<vmem>>, vector<2x128xf32>,
    } else {
    }
    %c0_i32_3 = arith.constant 0 : i32
    %5 = arith.cmpi sgt, %arg1, %c0_i32_3 : i32
    %6 = arith.extui %5 : i1 to i32
    %c0_i32_4 = arith.constant 0 : i32
    %7 = arith.cmpi ne, %6, %c0_i32_4 : i32
    scf.if %7 {
      %c0_5 = arith.constant 0 : index
      %c0_6 = arith.constant 0 : index
      %8 = vector.load %arg3[%c0_5, %c0_6] : memref<2x128xf32, #tpu.memory_space<vmem>>, vector<2x128xf32>
      %9 = arith.maximumf %8, %1 : vector<2x128xf32>
      %c0_7 = arith.constant 0 : index
      %c0_8 = arith.constant 0 : index
      %10 = vector.load %arg3[%c0_7, %c0_8] : memref<2x128xf32, #tpu.memory_space<vmem>>, vector<2x128xf32>
      tpu.vector_store %arg3[%c0_7, %c0_8], %9 {strides = array<i32>} : memref<2x128xf32, #tpu.memory_space<vmem>>, vector<2x128xf32>,
    } else {
    }
    return
  }
  func.func @transform_0(%arg0: i32, %arg1: i32) -> (i32, i32, i32) {
    %c0_i32 = arith.constant 0 : i32
    %c0_i32_0 = arith.constant 0 : i32
    return %arg1, %c0_i32, %arg0 : i32, i32, i32
  }
  func.func @transform_1(%arg0: i32, %arg1: i32) -> (i32, i32) {
    %c0_i32 = arith.constant 0 : i32
    %c0_i32_0 = arith.constant 0 : i32
    return %c0_i32, %arg0 : i32, i32
  }
}

</mosaic_0001>

<bundles_post_ra>
// kernel: tpu_custom_call.1
= control target key start
LH: loop header
LB: loop body
LE: loop exit
PB: predicated region body
PF: predicated region fallthrough
CT: control target
= control target key end

     0   :  { %6 = vsyncpa [#allocation3], 0  ;;  %s1164_s0 = inlined_call_operand.hbm [shape: f32[256,2,128], index: 0, kind: input, shape index: {}]   ;;  %s1165_s1 = inlined_call_operand.hbm [shape: f32[2,128], index: 1, kind: output, shape index: {}]  }
   0x1   :  { %7 = vsyncpa [#allocation4], 0  ;;  %s870_s6 = smov [#allocation2]   ;;  %s822_s10 = scalar_lea.hbm %s1164_s0, 8192 }
   0x2   :  { %s13_s7 = sshll.u32 %s870_s6, 4  ;;  %p823_p0 = scmp.ne.s32.totalorder %s1164_s0, %s822_s10  ;;  %s14_s7 = int_to_ptr.vmem [resolvable:$true] %s13_s7 }
   0x3   :  { %p826_p1 = scmp.lt.u32.totalorder %s822_s10, %s1164_s0 }
   0x5   :  { %p828_p2 = pnand %p826_p1, %p823_p0 }
   0x7   :  { %831 = shalt.err (!%p828_p2)
}
   0x8   :  { %s832_s15 = scalar_lea.vmem %s14_s7, 8192  ;;  %p837_p4 = scmp.lt.s32.totalorder %s14_s7, %s14_s7 }
   0x9   :  { %p833_p3 = scmp.ne.s32.totalorder %s14_s7, %s832_s15  ;;  %p838_p5 = scmp.lt.s32.totalorder %s832_s15, %s832_s15 }
   0xb   :  { %p839_p6 = por %p838_p5, %p837_p4 }
   0xd   :  { %p840_p7 = pnand %p839_p6, %p833_p3 }
   0xf   :  { %843 = shalt.err (!%p840_p7)
}
  0x10   :  { %s871_s16 = smov 32   ;;  %s872_s17 = smov 2  }
  0x11   :  { %19 = dma.hbm_to_vmem [thread:$0]  %s1164_s0, 8192, %s14_s7, [#allocation3], %s871_s16, %s871_s16, %s872_s17  }
  0x12   :  { %866 = dma.done.wait [#allocation3], 8192  }
  0x13   :  { %867 = vsyncadd [#allocation3], 4294959104  ;;  %v23_v0 = vld [vmem:[#allocation2] sm:$0x3]  ;;  %v24_v1 = vld [vmem:[#allocation2 + $0x2] sm:$0x3] }
  0x14   :  { %vm279_vm0 = vcmask 1041408   ;;  %v25_v2 = vld [vmem:[#allocation2 + $0x4] sm:$0x3]  ;;  %v26_v3 = vld [vmem:[#allocation2 + $0x6] sm:$0x3]  ;;  %s873_s0 = smov [#allocation5]  }
  0x15   :  { %v27_v4 = vld [vmem:[#allocation2 + $0x8] sm:$0x3]  ;;  %v28_v5 = vld [vmem:[#allocation2 + $0xa] sm:$0x3]  ;;  %v29_v6 = vld [vmem:[#allocation2 + $0xc] sm:$0x3] }
  0x16   :  { %v30_v7 = vld [vmem:[#allocation2 + $0xe] sm:$0x3]  ;;  %v31_v8 = vld [vmem:[#allocation2 + $0x10] sm:$0x3]  ;;  %v32_v9 = vld [vmem:[#allocation2 + $0x12] sm:$0x3] }
  0x17   :  { %v33_v10 = vld [vmem:[#allocation2 + $0x14] sm:$0x3]  ;;  %v34_v11 = vld [vmem:[#allocation2 + $0x16] sm:$0x3]  ;;  %v280_v12 = vsel %vm279_vm0, %v23_v0, -inf  ;;  %v281_v13 = vsel %vm279_vm0, %v24_v1, -inf }
  0x18   :  { %v282_v14 = vsel %vm279_vm0, %v25_v2, -inf  ;;  %v283_v15 = vsel %vm279_vm0, %v26_v3, -inf  ;;  %v35_v16 = vld [vmem:[#allocation2 + $0x18] sm:$0x3]  ;;  %v284_v17 = vsel %vm279_vm0, %v27_v4, -inf  ;;  %v286_v18 = vsel %vm279_vm0, %v28_v5, -inf }
  0x19   :  { %v288_v19 = vsel %vm279_vm0, %v29_v6, -inf  ;;  %v290_v20 = vsel %vm279_vm0, %v30_v7, -inf  ;;  %v36_v21 = vld [vmem:[#allocation2 + $0x1a] sm:$0x3]  ;;  %v37_v22 = vld [vmem:[#allocation2 + $0x1c] sm:$0x3]  ;;  %v285_v24 = vmax.f32 %v280_v12, %v284_v17  ;;  %v287_v25 = vmax.f32 %v281_v13, %v286_v18 }
  0x1a   :  { %v38_v23 = vld [vmem:[#allocation2 + $0x1e] sm:$0x3]  ;;  %v289_v26 = vmax.f32 %v282_v14, %v288_v19  ;;  %v291_v27 = vmax.f32 %v283_v15, %v290_v20  ;;  %v39_v28 = vld [vmem:[#allocation2 + $0x20] sm:$0x3]  ;;  %v292_v29 = vsel %vm279_vm0, %v31_v8, -inf  ;;  %v294_v30 = vsel %vm279_vm0, %v32_v9, -inf }
  0x1b   :  { %v296_v31 = vsel %vm279_vm0, %v33_v10, -inf  ;;  %v298_v32 = vsel %vm279_vm0, %v34_v11, -inf  ;;  %v40_v33 = vld [vmem:[#allocation2 + $0x22] sm:$0x3]  ;;  %v41_v34 = vld [vmem:[#allocation2 + $0x24] sm:$0x3]  ;;  %v293_v36 = vmax.f32 %v285_v24, %v292_v29  ;;  %v295_v37 = vmax.f32 %v287_v25, %v294_v30 }
  0x1c   :  { %v42_v35 = vld [vmem:[#allocation2 + $0x26] sm:$0x3]  ;;  %v297_v38 = vmax.f32 %v289_v26, %v296_v31  ;;  %v299_v39 = vmax.f32 %v291_v27, %v298_v32  ;;  %v43_v40 = vld [vmem:[#allocation2 + $0x28] sm:$0x3]  ;;  %v300_v41 = vsel %vm279_vm0, %v35_v16, -inf  ;;  %v302_v42 = vsel %vm279_vm0, %v36_v21, -inf }
  0x1d   :  { %v304_v43 = vsel %vm279_vm0, %v37_v22, -inf  ;;  %v306_v44 = vsel %vm279_vm0, %v38_v23, -inf  ;;  %v44_v45 = vld [vmem:[#allocation2 + $0x2a] sm:$0x3]  ;;  %v45_v46 = vld [vmem:[#allocation2 + $0x2c] sm:$0x3]  ;;  %v301_v48 = vmax.f32 %v293_v36, %v300_v41  ;;  %v303_v49 = vmax.f32 %v295_v37, %v302_v42 }
  0x1e   :  { %v46_v47 = vld [vmem:[#allocation2 + $0x2e] sm:$0x3]  ;;  %v305_v50 = vmax.f32 %v297_v38, %v304_v43  ;;  %v307_v51 = vmax.f32 %v299_v39, %v306_v44  ;;  %v47_v52 = vld [vmem:[#allocation2 + $0x30] sm:$0x3]  ;;  %v308_v53 = vsel %vm279_vm0, %v39_v28, -inf  ;;  %v310_v54 = vsel %vm279_vm0, %v40_v33, -inf }
  0x1f   :  { %v312_v55 = vsel %vm279_vm0, %v41_v34, -inf  ;;  %v314_v56 = vsel %vm279_vm0, %v42_v35, -inf  ;;  %v48_v57 = vld [vmem:[#allocation2 + $0x32] sm:$0x3]  ;;  %v49_v58 = vld [vmem:[#allocation2 + $0x34] sm:$0x3]  ;;  %v309_v60 = vmax.f32 %v301_v48, %v308_v53  ;;  %v311_v61 = vmax.f32 %v303_v49, %v310_v54 }
  0x20   :  { %v50_v59 = vld [vmem:[#allocation2 + $0x36] sm:$0x3]  ;;  %v313_v62 = vmax.f32 %v305_v50, %v312_v55  ;;  %v315_v63 = vmax.f32 %v307_v51, %v314_v56  ;;  %v51_v0 = vld [vmem:[#allocation2 + $0x38] sm:$0x3]  ;;  %v316_v1 = vsel %vm279_vm0, %v43_v40, -inf  ;;  %v318_v2 = vsel %vm279_vm0, %v44_v45, -inf }
  0x21   :  { %v320_v3 = vsel %vm279_vm0, %v45_v46, -inf  ;;  %v322_v4 = vsel %vm279_vm0, %v46_v47, -inf  ;;  %v52_v5 = vld [vmem:[#allocation2 + $0x3a] sm:$0x3]  ;;  %v53_v6 = vld [vmem:[#allocation2 + $0x3c] sm:$0x3]  ;;  %v317_v8 = vmax.f32 %v309_v60, %v316_v1  ;;  %v319_v9 = vmax.f32 %v311_v61, %v318_v2 }
  0x22   :  { %v54_v7 = vld [vmem:[#allocation2 + $0x3e] sm:$0x3]  ;;  %v321_v10 = vmax.f32 %v313_v62, %v320_v3  ;;  %v323_v11 = vmax.f32 %v315_v63, %v322_v4  ;;  %v55_v12 = vld [vmem:[#allocation2 + $0x40] sm:$0x3]  ;;  %v324_v13 = vsel %vm279_vm0, %v47_v52, -inf  ;;  %v326_v14 = vsel %vm279_vm0, %v48_v57, -inf }
  0x23   :  { %v328_v15 = vsel %vm279_vm0, %v49_v58, -inf  ;;  %v330_v16 = vsel %vm279_vm0, %v50_v59, -inf  ;;  %v56_v17 = vld [vmem:[#allocation2 + $0x42] sm:$0x3]  ;;  %v57_v18 = vld [vmem:[#allocation2 + $0x44] sm:$0x3]  ;;  %v325_v20 = vmax.f32 %v317_v8, %v324_v13  ;;  %v327_v21 = vmax.f32 %v319_v9, %v326_v14 }
  0x24   :  { %v58_v19 = vld [vmem:[#allocation2 + $0x46] sm:$0x3]  ;;  %v329_v22 = vmax.f32 %v321_v10, %v328_v15  ;;  %v331_v23 = vmax.f32 %v323_v11, %v330_v16  ;;  %v59_v24 = vld [vmem:[#allocation2 + $0x48] sm:$0x3]  ;;  %v332_v25 = vsel %vm279_vm0, %v51_v0, -inf  ;;  %v334_v26 = vsel %vm279_vm0, %v52_v5, -inf }
  0x25   :  { %v336_v27 = vsel %vm279_vm0, %v53_v6, -inf  ;;  %v338_v28 = vsel %vm279_vm0, %v54_v7, -inf  ;;  %v60_v29 = vld [vmem:[#allocation2 + $0x4a] sm:$0x3]  ;;  %v61_v30 = vld [vmem:[#allocation2 + $0x4c] sm:$0x3]  ;;  %v333_v32 = vmax.f32 %v325_v20, %v332_v25  ;;  %v335_v33 = vmax.f32 %v327_v21, %v334_v26 }
  0x26   :  { %v62_v31 = vld [vmem:[#allocation2 + $0x4e] sm:$0x3]  ;;  %v337_v34 = vmax.f32 %v329_v22, %v336_v27  ;;  %v339_v35 = vmax.f32 %v331_v23, %v338_v28  ;;  %v63_v36 = vld [vmem:[#allocation2 + $0x50] sm:$0x3]  ;;  %v340_v37 = vsel %vm279_vm0, %v55_v12, -inf  ;;  %v342_v38 = vsel %vm279_vm0, %v56_v17, -inf }
  0x27   :  { %v344_v39 = vsel %vm279_vm0, %v57_v18, -inf  ;;  %v346_v40 = vsel %vm279_vm0, %v58_v19, -inf  ;;  %v64_v41 = vld [vmem:[#allocation2 + $0x52] sm:$0x3]  ;;  %v65_v42 = vld [vmem:[#allocation2 + $0x54] sm:$0x3]  ;;  %v341_v44 = vmax.f32 %v333_v32, %v340_v37  ;;  %v343_v45 = vmax.f32 %v335_v33, %v342_v38 }
  0x28   :  { %v66_v43 = vld [vmem:[#allocation2 + $0x56] sm:$0x3]  ;;  %v345_v46 = vmax.f32 %v337_v34, %v344_v39  ;;  %v347_v47 = vmax.f32 %v339_v35, %v346_v40  ;;  %v67_v48 = vld [vmem:[#allocation2 + $0x58] sm:$0x3]  ;;  %v348_v49 = vsel %vm279_vm0, %v59_v24, -inf  ;;  %v350_v50 = vsel %vm279_vm0, %v60_v29, -inf }
  0x29   :  { %v352_v51 = vsel %vm279_vm0, %v61_v30, -inf  ;;  %v354_v52 = vsel %vm279_vm0, %v62_v31, -inf  ;;  %v68_v53 = vld [vmem:[#allocation2 + $0x5a] sm:$0x3]  ;;  %v69_v54 = vld [vmem:[#allocation2 + $0x5c] sm:$0x3]  ;;  %v349_v56 = vmax.f32 %v341_v44, %v348_v49  ;;  %v351_v57 = vmax.f32 %v343_v45, %v350_v50 }
  0x2a   :  { %v70_v55 = vld [vmem:[#allocation2 + $0x5e] sm:$0x3]  ;;  %v353_v58 = vmax.f32 %v345_v46, %v352_v51  ;;  %v355_v59 = vmax.f32 %v347_v47, %v354_v52  ;;  %v71_v60 = vld [vmem:[#allocation2 + $0x60] sm:$0x3]  ;;  %v356_v61 = vsel %vm279_vm0, %v63_v36, -inf  ;;  %v358_v62 = vsel %vm279_vm0, %v64_v41, -inf }
  0x2b   :  { %v360_v63 = vsel %vm279_vm0, %v65_v42, -inf  ;;  %v362_v0 = vsel %vm279_vm0, %v66_v43, -inf  ;;  %v72_v1 = vld [vmem:[#allocation2 + $0x62] sm:$0x3]  ;;  %v73_v2 = vld [vmem:[#allocation2 + $0x64] sm:$0x3]  ;;  %v357_v4 = vmax.f32 %v349_v56, %v356_v61  ;;  %v359_v5 = vmax.f32 %v351_v57, %v358_v62 }
  0x2c   :  { %v74_v3 = vld [vmem:[#allocation2 + $0x66] sm:$0x3]  ;;  %v361_v6 = vmax.f32 %v353_v58, %v360_v63  ;;  %v363_v7 = vmax.f32 %v355_v59, %v362_v0  ;;  %v75_v8 = vld [vmem:[#allocation2 + $0x68] sm:$0x3]  ;;  %v364_v9 = vsel %vm279_vm0, %v67_v48, -inf  ;;  %v366_v10 = vsel %vm279_vm0, %v68_v53, -inf }
  0x2d   :  { %v368_v11 = vsel %vm279_vm0, %v69_v54, -inf  ;;  %v370_v12 = vsel %vm279_vm0, %v70_v55, -inf  ;;  %v76_v13 = vld [vmem:[#allocation2 + $0x6a] sm:$0x3]  ;;  %v77_v14 = vld [vmem:[#allocation2 + $0x6c] sm:$0x3]  ;;  %v365_v16 = vmax.f32 %v357_v4, %v364_v9  ;;  %v367_v17 = vmax.f32 %v359_v5, %v366_v10 }
  0x2e   :  { %v78_v15 = vld [vmem:[#allocation2 + $0x6e] sm:$0x3]  ;;  %v369_v18 = vmax.f32 %v361_v6, %v368_v11  ;;  %v371_v19 = vmax.f32 %v363_v7, %v370_v12  ;;  %v79_v20 = vld [vmem:[#allocation2 + $0x70] sm:$0x3]  ;;  %v372_v21 = vsel %vm279_vm0, %v71_v60, -inf  ;;  %v374_v22 = vsel %vm279_vm0, %v72_v1, -inf }
  0x2f   :  { %v376_v23 = vsel %vm279_vm0, %v73_v2, -inf  ;;  %v378_v24 = vsel %vm279_vm0, %v74_v3, -inf  ;;  %v80_v25 = vld [vmem:[#allocation2 + $0x72] sm:$0x3]  ;;  %v81_v26 = vld [vmem:[#allocation2 + $0x74] sm:$0x3]  ;;  %v373_v28 = vmax.f32 %v365_v16, %v372_v21  ;;  %v375_v29 = vmax.f32 %v367_v17, %v374_v22 }
  0x30   :  { %v82_v27 = vld [vmem:[#allocation2 + $0x76] sm:$0x3]  ;;  %v377_v30 = vmax.f32 %v369_v18, %v376_v23  ;;  %v379_v31 = vmax.f32 %v371_v19, %v378_v24  ;;  %v83_v32 = vld [vmem:[#allocation2 + $0x78] sm:$0x3]  ;;  %v380_v33 = vsel %vm279_vm0, %v75_v8, -inf  ;;  %v382_v34 = vsel %vm279_vm0, %v76_v13, -inf }
  0x31   :  { %v384_v35 = vsel %vm279_vm0, %v77_v14, -inf  ;;  %v386_v36 = vsel %vm279_vm0, %v78_v15, -inf  ;;  %v84_v37 = vld [vmem:[#allocation2 + $0x7a] sm:$0x3]  ;;  %v85_v38 = vld [vmem:[#allocation2 + $0x7c] sm:$0x3]  ;;  %v381_v40 = vmax.f32 %v373_v28, %v380_v33  ;;  %v383_v41 = vmax.f32 %v375_v29, %v382_v34 }
  0x32   :  { %v86_v39 = vld [vmem:[#allocation2 + $0x7e] sm:$0x3]  ;;  %v385_v42 = vmax.f32 %v377_v30, %v384_v35  ;;  %v387_v43 = vmax.f32 %v379_v31, %v386_v36  ;;  %v87_v44 = vld [vmem:[#allocation2 + $0x80] sm:$0x3]  ;;  %v388_v45 = vsel %vm279_vm0, %v79_v20, -inf  ;;  %v390_v46 = vsel %vm279_vm0, %v80_v25, -inf }
  0x33   :  { %v392_v47 = vsel %vm279_vm0, %v81_v26, -inf  ;;  %v394_v48 = vsel %vm279_vm0, %v82_v27, -inf  ;;  %v88_v49 = vld [vmem:[#allocation2 + $0x82] sm:$0x3]  ;;  %v89_v50 = vld [vmem:[#allocation2 + $0x84] sm:$0x3]  ;;  %v389_v52 = vmax.f32 %v381_v40, %v388_v45  ;;  %v391_v53 = vmax.f32 %v383_v41, %v390_v46 }
  0x34   :  { %v90_v51 = vld [vmem:[#allocation2 + $0x86] sm:$0x3]  ;;  %v393_v54 = vmax.f32 %v385_v42, %v392_v47  ;;  %v395_v55 = vmax.f32 %v387_v43, %v394_v48  ;;  %v91_v56 = vld [vmem:[#allocation2 + $0x88] sm:$0x3]  ;;  %v396_v57 = vsel %vm279_vm0, %v83_v32, -inf  ;;  %v398_v58 = vsel %vm279_vm0, %v84_v37, -inf }
  0x35   :  { %v400_v59 = vsel %vm279_vm0, %v85_v38, -inf  ;;  %v402_v60 = vsel %vm279_vm0, %v86_v39, -inf  ;;  %v92_v61 = vld [vmem:[#allocation2 + $0x8a] sm:$0x3]  ;;  %v93_v62 = vld [vmem:[#allocation2 + $0x8c] sm:$0x3]  ;;  %v397_v0 = vmax.f32 %v389_v52, %v396_v57  ;;  %v399_v1 = vmax.f32 %v391_v53, %v398_v58 }
  0x36   :  { %v94_v63 = vld [vmem:[#allocation2 + $0x8e] sm:$0x3]  ;;  %v401_v2 = vmax.f32 %v393_v54, %v400_v59  ;;  %v403_v3 = vmax.f32 %v395_v55, %v402_v60  ;;  %v95_v4 = vld [vmem:[#allocation2 + $0x90] sm:$0x3]  ;;  %v404_v5 = vsel %vm279_vm0, %v87_v44, -inf  ;;  %v406_v6 = vsel %vm279_vm0, %v88_v49, -inf }
  0x37   :  { %v408_v7 = vsel %vm279_vm0, %v89_v50, -inf  ;;  %v410_v8 = vsel %vm279_vm0, %v90_v51, -inf  ;;  %v96_v9 = vld [vmem:[#allocation2 + $0x92] sm:$0x3]  ;;  %v97_v10 = vld [vmem:[#allocation2 + $0x94] sm:$0x3]  ;;  %v405_v12 = vmax.f32 %v397_v0, %v404_v5  ;;  %v407_v13 = vmax.f32 %v399_v1, %v406_v6 }
  0x38   :  { %v98_v11 = vld [vmem:[#allocation2 + $0x96] sm:$0x3]  ;;  %v409_v14 = vmax.f32 %v401_v2, %v408_v7  ;;  %v411_v15 = vmax.f32 %v403_v3, %v410_v8  ;;  %v99_v16 = vld [vmem:[#allocation2 + $0x98] sm:$0x3]  ;;  %v412_v17 = vsel %vm279_vm0, %v91_v56, -inf  ;;  %v414_v18 = vsel %vm279_vm0, %v92_v61, -inf }
  0x39   :  { %v416_v19 = vsel %vm279_vm0, %v93_v62, -inf  ;;  %v418_v20 = vsel %vm279_vm0, %v94_v63, -inf  ;;  %v100_v21 = vld [vmem:[#allocation2 + $0x9a] sm:$0x3]  ;;  %v101_v22 = vld [vmem:[#allocation2 + $0x9c] sm:$0x3]  ;;  %v413_v24 = vmax.f32 %v405_v12, %v412_v17  ;;  %v415_v25 = vmax.f32 %v407_v13, %v414_v18 }
  0x3a   :  { %v102_v23 = vld [vmem:[#allocation2 + $0x9e] sm:$0x3]  ;;  %v417_v26 = vmax.f32 %v409_v14, %v416_v19  ;;  %v419_v27 = vmax.f32 %v411_v15, %v418_v20  ;;  %v103_v28 = vld [vmem:[#allocation2 + $0xa0] sm:$0x3]  ;;  %v420_v29 = vsel %vm279_vm0, %v95_v4, -inf  ;;  %v422_v30 = vsel %vm279_vm0, %v96_v9, -inf }
  0x3b   :  { %v424_v31 = vsel %vm279_vm0, %v97_v10, -inf  ;;  %v426_v32 = vsel %vm279_vm0, %v98_v11, -inf  ;;  %v104_v33 = vld [vmem:[#allocation2 + $0xa2] sm:$0x3]  ;;  %v105_v34 = vld [vmem:[#allocation2 + $0xa4] sm:$0x3]  ;;  %v421_v36 = vmax.f32 %v413_v24, %v420_v29  ;;  %v423_v37 = vmax.f32 %v415_v25, %v422_v30 }
  0x3c   :  { %v106_v35 = vld [vmem:[#allocation2 + $0xa6] sm:$0x3]  ;;  %v425_v38 = vmax.f32 %v417_v26, %v424_v31  ;;  %v427_v39 = vmax.f32 %v419_v27, %v426_v32  ;;  %v107_v40 = vld [vmem:[#allocation2 + $0xa8] sm:$0x3]  ;;  %v428_v41 = vsel %vm279_vm0, %v99_v16, -inf  ;;  %v430_v42 = vsel %vm279_vm0, %v100_v21, -inf }
  0x3d   :  { %v432_v43 = vsel %vm279_vm0, %v101_v22, -inf  ;;  %v434_v44 = vsel %vm279_vm0, %v102_v23, -inf  ;;  %v108_v45 = vld [vmem:[#allocation2 + $0xaa] sm:$0x3]  ;;  %v109_v46 = vld [vmem:[#allocation2 + $0xac] sm:$0x3]  ;;  %v429_v48 = vmax.f32 %v421_v36, %v428_v41  ;;  %v431_v49 = vmax.f32 %v423_v37, %v430_v42 }
  0x3e   :  { %v110_v47 = vld [vmem:[#allocation2 + $0xae] sm:$0x3]  ;;  %v433_v50 = vmax.f32 %v425_v38, %v432_v43  ;;  %v435_v51 = vmax.f32 %v427_v39, %v434_v44  ;;  %v111_v52 = vld [vmem:[#allocation2 + $0xb0] sm:$0x3]  ;;  %v436_v53 = vsel %vm279_vm0, %v103_v28, -inf  ;;  %v438_v54 = vsel %vm279_vm0, %v104_v33, -inf }
  0x3f   :  { %v440_v55 = vsel %vm279_vm0, %v105_v34, -inf  ;;  %v442_v56 = vsel %vm279_vm0, %v106_v35, -inf  ;;  %v112_v57 = vld [vmem:[#allocation2 + $0xb2] sm:$0x3]  ;;  %v113_v58 = vld [vmem:[#allocation2 + $0xb4] sm:$0x3]  ;;  %v437_v60 = vmax.f32 %v429_v48, %v436_v53  ;;  %v439_v61 = vmax.f32 %v431_v49, %v438_v54 }
  0x40   :  { %v114_v59 = vld [vmem:[#allocation2 + $0xb6] sm:$0x3]  ;;  %v441_v62 = vmax.f32 %v433_v50, %v440_v55  ;;  %v443_v63 = vmax.f32 %v435_v51, %v442_v56  ;;  %v115_v0 = vld [vmem:[#allocation2 + $0xb8] sm:$0x3]  ;;  %v444_v1 = vsel %vm279_vm0, %v107_v40, -inf  ;;  %v446_v2 = vsel %vm279_vm0, %v108_v45, -inf }
  0x41   :  { %v448_v3 = vsel %vm279_vm0, %v109_v46, -inf  ;;  %v450_v4 = vsel %vm279_vm0, %v110_v47, -inf  ;;  %v116_v5 = vld [vmem:[#allocation2 + $0xba] sm:$0x3]  ;;  %v117_v6 = vld [vmem:[#allocation2 + $0xbc] sm:$0x3]  ;;  %v445_v8 = vmax.f32 %v437_v60, %v444_v1  ;;  %v447_v9 = vmax.f32 %v439_v61, %v446_v2 }
  0x42   :  { %v118_v7 = vld [vmem:[#allocation2 + $0xbe] sm:$0x3]  ;;  %v449_v10 = vmax.f32 %v441_v62, %v448_v3  ;;  %v451_v11 = vmax.f32 %v443_v63, %v450_v4  ;;  %v119_v12 = vld [vmem:[#allocation2 + $0xc0] sm:$0x3]  ;;  %v452_v13 = vsel %vm279_vm0, %v111_v52, -inf  ;;  %v454_v14 = vsel %vm279_vm0, %v112_v57, -inf }
  0x43   :  { %v456_v15 = vsel %vm279_vm0, %v113_v58, -inf  ;;  %v458_v16 = vsel %vm279_vm0, %v114_v59, -inf  ;;  %v120_v17 = vld [vmem:[#allocation2 + $0xc2] sm:$0x3]  ;;  %v121_v18 = vld [vmem:[#allocation2 + $0xc4] sm:$0x3]  ;;  %v453_v20 = vmax.f32 %v445_v8, %v452_v13  ;;  %v455_v21 = vmax.f32 %v447_v9, %v454_v14 }
  0x44   :  { %v122_v19 = vld [vmem:[#allocation2 + $0xc6] sm:$0x3]  ;;  %v457_v22 = vmax.f32 %v449_v10, %v456_v15  ;;  %v459_v23 = vmax.f32 %v451_v11, %v458_v16  ;;  %v123_v24 = vld [vmem:[#allocation2 + $0xc8] sm:$0x3]  ;;  %v460_v25 = vsel %vm279_vm0, %v115_v0, -inf  ;;  %v462_v26 = vsel %vm279_vm0, %v116_v5, -inf }
  0x45   :  { %v464_v27 = vsel %vm279_vm0, %v117_v6, -inf  ;;  %v466_v28 = vsel %vm279_vm0, %v118_v7, -inf  ;;  %v124_v29 = vld [vmem:[#allocation2 + $0xca] sm:$0x3]  ;;  %v125_v30 = vld [vmem:[#allocation2 + $0xcc] sm:$0x3]  ;;  %v461_v32 = vmax.f32 %v453_v20, %v460_v25  ;;  %v463_v33 = vmax.f32 %v455_v21, %v462_v26 }
  0x46   :  { %v126_v31 = vld [vmem:[#allocation2 + $0xce] sm:$0x3]  ;;  %v465_v34 = vmax.f32 %v457_v22, %v464_v27  ;;  %v467_v35 = vmax.f32 %v459_v23, %v466_v28  ;;  %v127_v36 = vld [vmem:[#allocation2 + $0xd0] sm:$0x3]  ;;  %v468_v37 = vsel %vm279_vm0, %v119_v12, -inf  ;;  %v470_v38 = vsel %vm279_vm0, %v120_v17, -inf }
  0x47   :  { %v472_v39 = vsel %vm279_vm0, %v121_v18, -inf  ;;  %v474_v40 = vsel %vm279_vm0, %v122_v19, -inf  ;;  %v128_v41 = vld [vmem:[#allocation2 + $0xd2] sm:$0x3]  ;;  %v129_v42 = vld [vmem:[#allocation2 + $0xd4] sm:$0x3]  ;;  %v469_v44 = vmax.f32 %v461_v32, %v468_v37  ;;  %v471_v45 = vmax.f32 %v463_v33, %v470_v38 }
  0x48   :  { %v130_v43 = vld [vmem:[#allocation2 + $0xd6] sm:$0x3]  ;;  %v473_v46 = vmax.f32 %v465_v34, %v472_v39  ;;  %v475_v47 = vmax.f32 %v467_v35, %v474_v40  ;;  %v131_v48 = vld [vmem:[#allocation2 + $0xd8] sm:$0x3]  ;;  %v476_v49 = vsel %vm279_vm0, %v123_v24, -inf  ;;  %v478_v50 = vsel %vm279_vm0, %v124_v29, -inf }
  0x49   :  { %v480_v51 = vsel %vm279_vm0, %v125_v30, -inf  ;;  %v482_v52 = vsel %vm279_vm0, %v126_v31, -inf  ;;  %v132_v53 = vld [vmem:[#allocation2 + $0xda] sm:$0x3]  ;;  %v133_v54 = vld [vmem:[#allocation2 + $0xdc] sm:$0x3]  ;;  %v477_v56 = vmax.f32 %v469_v44, %v476_v49  ;;  %v479_v57 = vmax.f32 %v471_v45, %v478_v50 }
  0x4a   :  { %v134_v55 = vld [vmem:[#allocation2 + $0xde] sm:$0x3]  ;;  %v481_v58 = vmax.f32 %v473_v46, %v480_v51  ;;  %v483_v59 = vmax.f32 %v475_v47, %v482_v52  ;;  %v135_v60 = vld [vmem:[#allocation2 + $0xe0] sm:$0x3]  ;;  %v484_v61 = vsel %vm279_vm0, %v127_v36, -inf  ;;  %v486_v62 = vsel %vm279_vm0, %v128_v41, -inf }
  0x4b   :  { %v488_v63 = vsel %vm279_vm0, %v129_v42, -inf  ;;  %v490_v0 = vsel %vm279_vm0, %v130_v43, -inf  ;;  %v136_v1 = vld [vmem:[#allocation2 + $0xe2] sm:$0x3]  ;;  %v137_v2 = vld [vmem:[#allocation2 + $0xe4] sm:$0x3]  ;;  %v485_v4 = vmax.f32 %v477_v56, %v484_v61  ;;  %v487_v5 = vmax.f32 %v479_v57, %v486_v62 }
  0x4c   :  { %v138_v3 = vld [vmem:[#allocation2 + $0xe6] sm:$0x3]  ;;  %v489_v6 = vmax.f32 %v481_v58, %v488_v63  ;;  %v491_v7 = vmax.f32 %v483_v59, %v490_v0  ;;  %v139_v8 = vld [vmem:[#allocation2 + $0xe8] sm:$0x3]  ;;  %v492_v9 = vsel %vm279_vm0, %v131_v48, -inf  ;;  %v494_v10 = vsel %vm279_vm0, %v132_v53, -inf }
  0x4d   :  { %v496_v11 = vsel %vm279_vm0, %v133_v54, -inf  ;;  %v498_v12 = vsel %vm279_vm0, %v134_v55, -inf  ;;  %v140_v13 = vld [vmem:[#allocation2 + $0xea] sm:$0x3]  ;;  %v141_v14 = vld [vmem:[#allocation2 + $0xec] sm:$0x3]  ;;  %v493_v16 = vmax.f32 %v485_v4, %v492_v9  ;;  %v495_v17 = vmax.f32 %v487_v5, %v494_v10 }
  0x4e   :  { %v142_v15 = vld [vmem:[#allocation2 + $0xee] sm:$0x3]  ;;  %v497_v18 = vmax.f32 %v489_v6, %v496_v11  ;;  %v499_v19 = vmax.f32 %v491_v7, %v498_v12  ;;  %v143_v20 = vld [vmem:[#allocation2 + $0xf0] sm:$0x3]  ;;  %v500_v21 = vsel %vm279_vm0, %v135_v60, -inf  ;;  %v502_v22 = vsel %vm279_vm0, %v136_v1, -inf }
  0x4f   :  { %v504_v23 = vsel %vm279_vm0, %v137_v2, -inf  ;;  %v506_v24 = vsel %vm279_vm0, %v138_v3, -inf  ;;  %v144_v25 = vld [vmem:[#allocation2 + $0xf2] sm:$0x3]  ;;  %v145_v26 = vld [vmem:[#allocation2 + $0xf4] sm:$0x3]  ;;  %v501_v28 = vmax.f32 %v493_v16, %v500_v21  ;;  %v503_v29 = vmax.f32 %v495_v17, %v502_v22 }
  0x50   :  { %v146_v27 = vld [vmem:[#allocation2 + $0xf6] sm:$0x3]  ;;  %v505_v30 = vmax.f32 %v497_v18, %v504_v23  ;;  %v507_v31 = vmax.f32 %v499_v19, %v506_v24  ;;  %v147_v32 = vld [vmem:[#allocation2 + $0xf8] sm:$0x3]  ;;  %v508_v33 = vsel %vm279_vm0, %v139_v8, -inf  ;;  %v510_v34 = vsel %vm279_vm0, %v140_v13, -inf }
  0x51   :  { %v512_v35 = vsel %vm279_vm0, %v141_v14, -inf  ;;  %v514_v36 = vsel %vm279_vm0, %v142_v15, -inf  ;;  %v148_v37 = vld [vmem:[#allocation2 + $0xfa] sm:$0x3]  ;;  %v149_v38 = vld [vmem:[#allocation2 + $0xfc] sm:$0x3]  ;;  %v509_v40 = vmax.f32 %v501_v28, %v508_v33  ;;  %v511_v41 = vmax.f32 %v503_v29, %v510_v34 }
  0x52   :  { %v150_v39 = vld [vmem:[#allocation2 + $0xfe] sm:$0x3]  ;;  %v513_v42 = vmax.f32 %v505_v30, %v512_v35  ;;  %v515_v43 = vmax.f32 %v507_v31, %v514_v36  ;;  %v151_v44 = vld [vmem:[#allocation2 + $0x100] sm:$0x3]  ;;  %v516_v45 = vsel %vm279_vm0, %v143_v20, -inf  ;;  %v518_v46 = vsel %vm279_vm0, %v144_v25, -inf }
  0x53   :  { %v520_v47 = vsel %vm279_vm0, %v145_v26, -inf  ;;  %v522_v48 = vsel %vm279_vm0, %v146_v27, -inf  ;;  %v152_v49 = vld [vmem:[#allocation2 + $0x102] sm:$0x3]  ;;  %v153_v50 = vld [vmem:[#allocation2 + $0x104] sm:$0x3]  ;;  %v517_v52 = vmax.f32 %v509_v40, %v516_v45  ;;  %v519_v53 = vmax.f32 %v511_v41, %v518_v46 }
  0x54   :  { %v154_v51 = vld [vmem:[#allocation2 + $0x106] sm:$0x3]  ;;  %v521_v54 = vmax.f32 %v513_v42, %v520_v47  ;;  %v523_v55 = vmax.f32 %v515_v43, %v522_v48  ;;  %v155_v56 = vld [vmem:[#allocation2 + $0x108] sm:$0x3]  ;;  %v524_v57 = vsel %vm279_vm0, %v147_v32, -inf  ;;  %v526_v58 = vsel %vm279_vm0, %v148_v37, -inf }
  0x55   :  { %v528_v59 = vsel %vm279_vm0, %v149_v38, -inf  ;;  %v530_v60 = vsel %vm279_vm0, %v150_v39, -inf  ;;  %v156_v61 = vld [vmem:[#allocation2 + $0x10a] sm:$0x3]  ;;  %v157_v62 = vld [vmem:[#allocation2 + $0x10c] sm:$0x3]  ;;  %v525_v0 = vmax.f32 %v517_v52, %v524_v57  ;;  %v527_v1 = vmax.f32 %v519_v53, %v526_v58 }
  0x56   :  { %v158_v63 = vld [vmem:[#allocation2 + $0x10e] sm:$0x3]  ;;  %v529_v2 = vmax.f32 %v521_v54, %v528_v59  ;;  %v531_v3 = vmax.f32 %v523_v55, %v530_v60  ;;  %v159_v4 = vld [vmem:[#allocation2 + $0x110] sm:$0x3]  ;;  %v532_v5 = vsel %vm279_vm0, %v151_v44, -inf  ;;  %v534_v6 = vsel %vm279_vm0, %v152_v49, -inf }
  0x57   :  { %v536_v7 = vsel %vm279_vm0, %v153_v50, -inf  ;;  %v538_v8 = vsel %vm279_vm0, %v154_v51, -inf  ;;  %v160_v9 = vld [vmem:[#allocation2 + $0x112] sm:$0x3]  ;;  %v161_v10 = vld [vmem:[#allocation2 + $0x114] sm:$0x3]  ;;  %v533_v12 = vmax.f32 %v525_v0, %v532_v5  ;;  %v535_v13 = vmax.f32 %v527_v1, %v534_v6 }
  0x58   :  { %v162_v11 = vld [vmem:[#allocation2 + $0x116] sm:$0x3]  ;;  %v537_v14 = vmax.f32 %v529_v2, %v536_v7  ;;  %v539_v15 = vmax.f32 %v531_v3, %v538_v8  ;;  %v163_v16 = vld [vmem:[#allocation2 + $0x118] sm:$0x3]  ;;  %v540_v17 = vsel %vm279_vm0, %v155_v56, -inf  ;;  %v542_v18 = vsel %vm279_vm0, %v156_v61, -inf }
  0x59   :  { %v544_v19 = vsel %vm279_vm0, %v157_v62, -inf  ;;  %v546_v20 = vsel %vm279_vm0, %v158_v63, -inf  ;;  %v164_v21 = vld [vmem:[#allocation2 + $0x11a] sm:$0x3]  ;;  %v165_v22 = vld [vmem:[#allocation2 + $0x11c] sm:$0x3]  ;;  %v541_v24 = vmax.f32 %v533_v12, %v540_v17  ;;  %v543_v25 = vmax.f32 %v535_v13, %v542_v18 }
  0x5a   :  { %v166_v23 = vld [vmem:[#allocation2 + $0x11e] sm:$0x3]  ;;  %v545_v26 = vmax.f32 %v537_v14, %v544_v19  ;;  %v547_v27 = vmax.f32 %v539_v15, %v546_v20  ;;  %v167_v28 = vld [vmem:[#allocation2 + $0x120] sm:$0x3]  ;;  %v548_v29 = vsel %vm279_vm0, %v159_v4, -inf  ;;  %v550_v30 = vsel %vm279_vm0, %v160_v9, -inf }
  0x5b   :  { %v552_v31 = vsel %vm279_vm0, %v161_v10, -inf  ;;  %v554_v32 = vsel %vm279_vm0, %v162_v11, -inf  ;;  %v168_v33 = vld [vmem:[#allocation2 + $0x122] sm:$0x3]  ;;  %v169_v34 = vld [vmem:[#allocation2 + $0x124] sm:$0x3]  ;;  %v549_v36 = vmax.f32 %v541_v24, %v548_v29  ;;  %v551_v37 = vmax.f32 %v543_v25, %v550_v30 }
  0x5c   :  { %v170_v35 = vld [vmem:[#allocation2 + $0x126] sm:$0x3]  ;;  %v553_v38 = vmax.f32 %v545_v26, %v552_v31  ;;  %v555_v39 = vmax.f32 %v547_v27, %v554_v32  ;;  %v171_v40 = vld [vmem:[#allocation2 + $0x128] sm:$0x3]  ;;  %v556_v41 = vsel %vm279_vm0, %v163_v16, -inf  ;;  %v558_v42 = vsel %vm279_vm0, %v164_v21, -inf }
  0x5d   :  { %v560_v43 = vsel %vm279_vm0, %v165_v22, -inf  ;;  %v562_v44 = vsel %vm279_vm0, %v166_v23, -inf  ;;  %v172_v45 = vld [vmem:[#allocation2 + $0x12a] sm:$0x3]  ;;  %v173_v46 = vld [vmem:[#allocation2 + $0x12c] sm:$0x3]  ;;  %v557_v48 = vmax.f32 %v549_v36, %v556_v41  ;;  %v559_v49 = vmax.f32 %v551_v37, %v558_v42 }
  0x5e   :  { %v174_v47 = vld [vmem:[#allocation2 + $0x12e] sm:$0x3]  ;;  %v561_v50 = vmax.f32 %v553_v38, %v560_v43  ;;  %v563_v51 = vmax.f32 %v555_v39, %v562_v44  ;;  %v175_v52 = vld [vmem:[#allocation2 + $0x130] sm:$0x3]  ;;  %v564_v53 = vsel %vm279_vm0, %v167_v28, -inf  ;;  %v566_v54 = vsel %vm279_vm0, %v168_v33, -inf }
  0x5f   :  { %v568_v55 = vsel %vm279_vm0, %v169_v34, -inf  ;;  %v570_v56 = vsel %vm279_vm0, %v170_v35, -inf  ;;  %v176_v57 = vld [vmem:[#allocation2 + $0x132] sm:$0x3]  ;;  %v177_v58 = vld [vmem:[#allocation2 + $0x134] sm:$0x3]  ;;  %v565_v60 = vmax.f32 %v557_v48, %v564_v53  ;;  %v567_v61 = vmax.f32 %v559_v49, %v566_v54 }
  0x60   :  { %v178_v59 = vld [vmem:[#allocation2 + $0x136] sm:$0x3]  ;;  %v569_v62 = vmax.f32 %v561_v50, %v568_v55  ;;  %v571_v63 = vmax.f32 %v563_v51, %v570_v56  ;;  %v179_v0 = vld [vmem:[#allocation2 + $0x138] sm:$0x3]  ;;  %v572_v1 = vsel %vm279_vm0, %v171_v40, -inf  ;;  %v574_v2 = vsel %vm279_vm0, %v172_v45, -inf }
  0x61   :  { %v576_v3 = vsel %vm279_vm0, %v173_v46, -inf  ;;  %v578_v4 = vsel %vm279_vm0, %v174_v47, -inf  ;;  %v180_v5 = vld [vmem:[#allocation2 + $0x13a] sm:$0x3]  ;;  %v181_v6 = vld [vmem:[#allocation2 + $0x13c] sm:$0x3]  ;;  %v573_v8 = vmax.f32 %v565_v60, %v572_v1  ;;  %v575_v9 = vmax.f32 %v567_v61, %v574_v2 }
  0x62   :  { %v182_v7 = vld [vmem:[#allocation2 + $0x13e] sm:$0x3]  ;;  %v577_v10 = vmax.f32 %v569_v62, %v576_v3  ;;  %v579_v11 = vmax.f32 %v571_v63, %v578_v4  ;;  %v183_v12 = vld [vmem:[#allocation2 + $0x140] sm:$0x3]  ;;  %v580_v13 = vsel %vm279_vm0, %v175_v52, -inf  ;;  %v582_v14 = vsel %vm279_vm0, %v176_v57, -inf }
  0x63   :  { %v584_v15 = vsel %vm279_vm0, %v177_v58, -inf  ;;  %v586_v16 = vsel %vm279_vm0, %v178_v59, -inf  ;;  %v184_v17 = vld [vmem:[#allocation2 + $0x142] sm:$0x3]  ;;  %v185_v18 = vld [vmem:[#allocation2 + $0x144] sm:$0x3]  ;;  %v581_v20 = vmax.f32 %v573_v8, %v580_v13  ;;  %v583_v21 = vmax.f32 %v575_v9, %v582_v14 }
  0x64   :  { %v186_v19 = vld [vmem:[#allocation2 + $0x146] sm:$0x3]  ;;  %v585_v22 = vmax.f32 %v577_v10, %v584_v15  ;;  %v587_v23 = vmax.f32 %v579_v11, %v586_v16  ;;  %v187_v24 = vld [vmem:[#allocation2 + $0x148] sm:$0x3]  ;;  %v588_v25 = vsel %vm279_vm0, %v179_v0, -inf  ;;  %v590_v26 = vsel %vm279_vm0, %v180_v5, -inf }
  0x65   :  { %v592_v27 = vsel %vm279_vm0, %v181_v6, -inf  ;;  %v594_v28 = vsel %vm279_vm0, %v182_v7, -inf  ;;  %v188_v29 = vld [vmem:[#allocation2 + $0x14a] sm:$0x3]  ;;  %v189_v30 = vld [vmem:[#allocation2 + $0x14c] sm:$0x3]  ;;  %v589_v32 = vmax.f32 %v581_v20, %v588_v25  ;;  %v591_v33 = vmax.f32 %v583_v21, %v590_v26 }
  0x66   :  { %v190_v31 = vld [vmem:[#allocation2 + $0x14e] sm:$0x3]  ;;  %v593_v34 = vmax.f32 %v585_v22, %v592_v27  ;;  %v595_v35 = vmax.f32 %v587_v23, %v594_v28  ;;  %v191_v36 = vld [vmem:[#allocation2 + $0x150] sm:$0x3]  ;;  %v596_v37 = vsel %vm279_vm0, %v183_v12, -inf  ;;  %v598_v38 = vsel %vm279_vm0, %v184_v17, -inf }
  0x67   :  { %v600_v39 = vsel %vm279_vm0, %v185_v18, -inf  ;;  %v602_v40 = vsel %vm279_vm0, %v186_v19, -inf  ;;  %v192_v41 = vld [vmem:[#allocation2 + $0x152] sm:$0x3]  ;;  %v193_v42 = vld [vmem:[#allocation2 + $0x154] sm:$0x3]  ;;  %v597_v44 = vmax.f32 %v589_v32, %v596_v37  ;;  %v599_v45 = vmax.f32 %v591_v33, %v598_v38 }
  0x68   :  { %v194_v43 = vld [vmem:[#allocation2 + $0x156] sm:$0x3]  ;;  %v601_v46 = vmax.f32 %v593_v34, %v600_v39  ;;  %v603_v47 = vmax.f32 %v595_v35, %v602_v40  ;;  %v195_v48 = vld [vmem:[#allocation2 + $0x158] sm:$0x3]  ;;  %v604_v49 = vsel %vm279_vm0, %v187_v24, -inf  ;;  %v606_v50 = vsel %vm279_vm0, %v188_v29, -inf }
  0x69   :  { %v608_v51 = vsel %vm279_vm0, %v189_v30, -inf  ;;  %v610_v52 = vsel %vm279_vm0, %v190_v31, -inf  ;;  %v196_v53 = vld [vmem:[#allocation2 + $0x15a] sm:$0x3]  ;;  %v197_v54 = vld [vmem:[#allocation2 + $0x15c] sm:$0x3]  ;;  %v605_v56 = vmax.f32 %v597_v44, %v604_v49  ;;  %v607_v57 = vmax.f32 %v599_v45, %v606_v50 }
  0x6a   :  { %v198_v55 = vld [vmem:[#allocation2 + $0x15e] sm:$0x3]  ;;  %v609_v58 = vmax.f32 %v601_v46, %v608_v51  ;;  %v611_v59 = vmax.f32 %v603_v47, %v610_v52  ;;  %v199_v60 = vld [vmem:[#allocation2 + $0x160] sm:$0x3]  ;;  %v612_v61 = vsel %vm279_vm0, %v191_v36, -inf  ;;  %v614_v62 = vsel %vm279_vm0, %v192_v41, -inf }
  0x6b   :  { %v616_v63 = vsel %vm279_vm0, %v193_v42, -inf  ;;  %v618_v0 = vsel %vm279_vm0, %v194_v43, -inf  ;;  %v200_v1 = vld [vmem:[#allocation2 + $0x162] sm:$0x3]  ;;  %v201_v2 = vld [vmem:[#allocation2 + $0x164] sm:$0x3]  ;;  %v613_v4 = vmax.f32 %v605_v56, %v612_v61  ;;  %v615_v5 = vmax.f32 %v607_v57, %v614_v62 }
  0x6c   :  { %v202_v3 = vld [vmem:[#allocation2 + $0x166] sm:$0x3]  ;;  %v617_v6 = vmax.f32 %v609_v58, %v616_v63  ;;  %v619_v7 = vmax.f32 %v611_v59, %v618_v0  ;;  %v203_v8 = vld [vmem:[#allocation2 + $0x168] sm:$0x3]  ;;  %v620_v9 = vsel %vm279_vm0, %v195_v48, -inf  ;;  %v622_v10 = vsel %vm279_vm0, %v196_v53, -inf }
  0x6d   :  { %v624_v11 = vsel %vm279_vm0, %v197_v54, -inf  ;;  %v626_v12 = vsel %vm279_vm0, %v198_v55, -inf  ;;  %v204_v13 = vld [vmem:[#allocation2 + $0x16a] sm:$0x3]  ;;  %v205_v14 = vld [vmem:[#allocation2 + $0x16c] sm:$0x3]  ;;  %v621_v16 = vmax.f32 %v613_v4, %v620_v9  ;;  %v623_v17 = vmax.f32 %v615_v5, %v622_v10 }
  0x6e   :  { %v206_v15 = vld [vmem:[#allocation2 + $0x16e] sm:$0x3]  ;;  %v625_v18 = vmax.f32 %v617_v6, %v624_v11  ;;  %v627_v19 = vmax.f32 %v619_v7, %v626_v12  ;;  %v207_v20 = vld [vmem:[#allocation2 + $0x170] sm:$0x3]  ;;  %v628_v21 = vsel %vm279_vm0, %v199_v60, -inf  ;;  %v630_v22 = vsel %vm279_vm0, %v200_v1, -inf }
  0x6f   :  { %v632_v23 = vsel %vm279_vm0, %v201_v2, -inf  ;;  %v634_v24 = vsel %vm279_vm0, %v202_v3, -inf  ;;  %v208_v25 = vld [vmem:[#allocation2 + $0x172] sm:$0x3]  ;;  %v209_v26 = vld [vmem:[#allocation2 + $0x174] sm:$0x3]  ;;  %v629_v28 = vmax.f32 %v621_v16, %v628_v21  ;;  %v631_v29 = vmax.f32 %v623_v17, %v630_v22 }
  0x70   :  { %v210_v27 = vld [vmem:[#allocation2 + $0x176] sm:$0x3]  ;;  %v633_v30 = vmax.f32 %v625_v18, %v632_v23  ;;  %v635_v31 = vmax.f32 %v627_v19, %v634_v24  ;;  %v211_v32 = vld [vmem:[#allocation2 + $0x178] sm:$0x3]  ;;  %v636_v33 = vsel %vm279_vm0, %v203_v8, -inf  ;;  %v638_v34 = vsel %vm279_vm0, %v204_v13, -inf }
  0x71   :  { %v640_v35 = vsel %vm279_vm0, %v205_v14, -inf  ;;  %v642_v36 = vsel %vm279_vm0, %v206_v15, -inf  ;;  %v212_v37 = vld [vmem:[#allocation2 + $0x17a] sm:$0x3]  ;;  %v213_v38 = vld [vmem:[#allocation2 + $0x17c] sm:$0x3]  ;;  %v637_v40 = vmax.f32 %v629_v28, %v636_v33  ;;  %v639_v41 = vmax.f32 %v631_v29, %v638_v34 }
  0x72   :  { %v214_v39 = vld [vmem:[#allocation2 + $0x17e] sm:$0x3]  ;;  %v641_v42 = vmax.f32 %v633_v30, %v640_v35  ;;  %v643_v43 = vmax.f32 %v635_v31, %v642_v36  ;;  %v215_v44 = vld [vmem:[#allocation2 + $0x180] sm:$0x3]  ;;  %v644_v45 = vsel %vm279_vm0, %v207_v20, -inf  ;;  %v646_v46 = vsel %vm279_vm0, %v208_v25, -inf }
  0x73   :  { %v648_v47 = vsel %vm279_vm0, %v209_v26, -inf  ;;  %v650_v48 = vsel %vm279_vm0, %v210_v27, -inf  ;;  %v216_v49 = vld [vmem:[#allocation2 + $0x182] sm:$0x3]  ;;  %v217_v50 = vld [vmem:[#allocation2 + $0x184] sm:$0x3]  ;;  %v645_v52 = vmax.f32 %v637_v40, %v644_v45  ;;  %v647_v53 = vmax.f32 %v639_v41, %v646_v46 }
  0x74   :  { %v218_v51 = vld [vmem:[#allocation2 + $0x186] sm:$0x3]  ;;  %v649_v54 = vmax.f32 %v641_v42, %v648_v47  ;;  %v651_v55 = vmax.f32 %v643_v43, %v650_v48  ;;  %v219_v56 = vld [vmem:[#allocation2 + $0x188] sm:$0x3]  ;;  %v652_v57 = vsel %vm279_vm0, %v211_v32, -inf  ;;  %v654_v58 = vsel %vm279_vm0, %v212_v37, -inf }
  0x75   :  { %v656_v59 = vsel %vm279_vm0, %v213_v38, -inf  ;;  %v658_v60 = vsel %vm279_vm0, %v214_v39, -inf  ;;  %v220_v61 = vld [vmem:[#allocation2 + $0x18a] sm:$0x3]  ;;  %v221_v62 = vld [vmem:[#allocation2 + $0x18c] sm:$0x3]  ;;  %v653_v0 = vmax.f32 %v645_v52, %v652_v57  ;;  %v655_v1 = vmax.f32 %v647_v53, %v654_v58 }
  0x76   :  { %v222_v63 = vld [vmem:[#allocation2 + $0x18e] sm:$0x3]  ;;  %v657_v2 = vmax.f32 %v649_v54, %v656_v59  ;;  %v659_v3 = vmax.f32 %v651_v55, %v658_v60  ;;  %v223_v4 = vld [vmem:[#allocation2 + $0x190] sm:$0x3]  ;;  %v660_v5 = vsel %vm279_vm0, %v215_v44, -inf  ;;  %v662_v6 = vsel %vm279_vm0, %v216_v49, -inf }
  0x77   :  { %v664_v7 = vsel %vm279_vm0, %v217_v50, -inf  ;;  %v666_v8 = vsel %vm279_vm0, %v218_v51, -inf  ;;  %v224_v9 = vld [vmem:[#allocation2 + $0x192] sm:$0x3]  ;;  %v225_v10 = vld [vmem:[#allocation2 + $0x194] sm:$0x3]  ;;  %v661_v12 = vmax.f32 %v653_v0, %v660_v5  ;;  %v663_v13 = vmax.f32 %v655_v1, %v662_v6 }
  0x78   :  { %v226_v11 = vld [vmem:[#allocation2 + $0x196] sm:$0x3]  ;;  %v665_v14 = vmax.f32 %v657_v2, %v664_v7  ;;  %v667_v15 = vmax.f32 %v659_v3, %v666_v8  ;;  %v227_v16 = vld [vmem:[#allocation2 + $0x198] sm:$0x3]  ;;  %v668_v17 = vsel %vm279_vm0, %v219_v56, -inf  ;;  %v670_v18 = vsel %vm279_vm0, %v220_v61, -inf }
  0x79   :  { %v672_v19 = vsel %vm279_vm0, %v221_v62, -inf  ;;  %v674_v20 = vsel %vm279_vm0, %v222_v63, -inf  ;;  %v228_v21 = vld [vmem:[#allocation2 + $0x19a] sm:$0x3]  ;;  %v229_v22 = vld [vmem:[#allocation2 + $0x19c] sm:$0x3]  ;;  %v669_v24 = vmax.f32 %v661_v12, %v668_v17  ;;  %v671_v25 = vmax.f32 %v663_v13, %v670_v18 }
  0x7a   :  { %v230_v23 = vld [vmem:[#allocation2 + $0x19e] sm:$0x3]  ;;  %v673_v26 = vmax.f32 %v665_v14, %v672_v19  ;;  %v675_v27 = vmax.f32 %v667_v15, %v674_v20  ;;  %v231_v28 = vld [vmem:[#allocation2 + $0x1a0] sm:$0x3]  ;;  %v676_v29 = vsel %vm279_vm0, %v223_v4, -inf  ;;  %v678_v30 = vsel %vm279_vm0, %v224_v9, -inf }
  0x7b   :  { %v680_v31 = vsel %vm279_vm0, %v225_v10, -inf  ;;  %v682_v32 = vsel %vm279_vm0, %v226_v11, -inf  ;;  %v232_v33 = vld [vmem:[#allocation2 + $0x1a2] sm:$0x3]  ;;  %v233_v34 = vld [vmem:[#allocation2 + $0x1a4] sm:$0x3]  ;;  %v677_v36 = vmax.f32 %v669_v24, %v676_v29  ;;  %v679_v37 = vmax.f32 %v671_v25, %v678_v30 }
  0x7c   :  { %v234_v35 = vld [vmem:[#allocation2 + $0x1a6] sm:$0x3]  ;;  %v681_v38 = vmax.f32 %v673_v26, %v680_v31  ;;  %v683_v39 = vmax.f32 %v675_v27, %v682_v32  ;;  %v235_v40 = vld [vmem:[#allocation2 + $0x1a8] sm:$0x3]  ;;  %v684_v41 = vsel %vm279_vm0, %v227_v16, -inf  ;;  %v686_v42 = vsel %vm279_vm0, %v228_v21, -inf }
  0x7d   :  { %v688_v43 = vsel %vm279_vm0, %v229_v22, -inf  ;;  %v690_v44 = vsel %vm279_vm0, %v230_v23, -inf  ;;  %v236_v45 = vld [vmem:[#allocation2 + $0x1aa] sm:$0x3]  ;;  %v237_v46 = vld [vmem:[#allocation2 + $0x1ac] sm:$0x3]  ;;  %v685_v48 = vmax.f32 %v677_v36, %v684_v41  ;;  %v687_v49 = vmax.f32 %v679_v37, %v686_v42 }
  0x7e   :  { %v238_v47 = vld [vmem:[#allocation2 + $0x1ae] sm:$0x3]  ;;  %v689_v50 = vmax.f32 %v681_v38, %v688_v43  ;;  %v691_v51 = vmax.f32 %v683_v39, %v690_v44  ;;  %v239_v52 = vld [vmem:[#allocation2 + $0x1b0] sm:$0x3]  ;;  %v692_v53 = vsel %vm279_vm0, %v231_v28, -inf  ;;  %v694_v54 = vsel %vm279_vm0, %v232_v33, -inf }
  0x7f   :  { %v696_v55 = vsel %vm279_vm0, %v233_v34, -inf  ;;  %v698_v56 = vsel %vm279_vm0, %v234_v35, -inf  ;;  %v240_v57 = vld [vmem:[#allocation2 + $0x1b2] sm:$0x3]  ;;  %v241_v58 = vld [vmem:[#allocation2 + $0x1b4] sm:$0x3]  ;;  %v693_v60 = vmax.f32 %v685_v48, %v692_v53  ;;  %v695_v61 = vmax.f32 %v687_v49, %v694_v54 }
  0x80   :  { %v242_v59 = vld [vmem:[#allocation2 + $0x1b6] sm:$0x3]  ;;  %v697_v62 = vmax.f32 %v689_v50, %v696_v55  ;;  %v699_v63 = vmax.f32 %v691_v51, %v698_v56  ;;  %v243_v0 = vld [vmem:[#allocation2 + $0x1b8] sm:$0x3]  ;;  %v700_v1 = vsel %vm279_vm0, %v235_v40, -inf  ;;  %v702_v2 = vsel %vm279_vm0, %v236_v45, -inf }
  0x81   :  { %v704_v3 = vsel %vm279_vm0, %v237_v46, -inf  ;;  %v706_v4 = vsel %vm279_vm0, %v238_v47, -inf  ;;  %v244_v5 = vld [vmem:[#allocation2 + $0x1ba] sm:$0x3]  ;;  %v245_v6 = vld [vmem:[#allocation2 + $0x1bc] sm:$0x3]  ;;  %v701_v8 = vmax.f32 %v693_v60, %v700_v1  ;;  %v703_v9 = vmax.f32 %v695_v61, %v702_v2 }
  0x82   :  { %v246_v7 = vld [vmem:[#allocation2 + $0x1be] sm:$0x3]  ;;  %v705_v10 = vmax.f32 %v697_v62, %v704_v3  ;;  %v707_v11 = vmax.f32 %v699_v63, %v706_v4  ;;  %v247_v12 = vld [vmem:[#allocation2 + $0x1c0] sm:$0x3]  ;;  %v708_v13 = vsel %vm279_vm0, %v239_v52, -inf  ;;  %v710_v14 = vsel %vm279_vm0, %v240_v57, -inf }
  0x83   :  { %v712_v15 = vsel %vm279_vm0, %v241_v58, -inf  ;;  %v714_v16 = vsel %vm279_vm0, %v242_v59, -inf  ;;  %v248_v17 = vld [vmem:[#allocation2 + $0x1c2] sm:$0x3]  ;;  %v249_v18 = vld [vmem:[#allocation2 + $0x1c4] sm:$0x3]  ;;  %v709_v20 = vmax.f32 %v701_v8, %v708_v13  ;;  %v711_v21 = vmax.f32 %v703_v9, %v710_v14 }
  0x84   :  { %v250_v19 = vld [vmem:[#allocation2 + $0x1c6] sm:$0x3]  ;;  %v713_v22 = vmax.f32 %v705_v10, %v712_v15  ;;  %v715_v23 = vmax.f32 %v707_v11, %v714_v16  ;;  %v251_v24 = vld [vmem:[#allocation2 + $0x1c8] sm:$0x3]  ;;  %v716_v25 = vsel %vm279_vm0, %v243_v0, -inf  ;;  %v718_v26 = vsel %vm279_vm0, %v244_v5, -inf }
  0x85   :  { %v720_v27 = vsel %vm279_vm0, %v245_v6, -inf  ;;  %v722_v28 = vsel %vm279_vm0, %v246_v7, -inf  ;;  %v252_v29 = vld [vmem:[#allocation2 + $0x1ca] sm:$0x3]  ;;  %v253_v30 = vld [vmem:[#allocation2 + $0x1cc] sm:$0x3]  ;;  %v717_v32 = vmax.f32 %v709_v20, %v716_v25  ;;  %v719_v33 = vmax.f32 %v711_v21, %v718_v26 }
  0x86   :  { %v254_v31 = vld [vmem:[#allocation2 + $0x1ce] sm:$0x3]  ;;  %v721_v34 = vmax.f32 %v713_v22, %v720_v27  ;;  %v723_v35 = vmax.f32 %v715_v23, %v722_v28  ;;  %v255_v36 = vld [vmem:[#allocation2 + $0x1d0] sm:$0x3]  ;;  %v724_v37 = vsel %vm279_vm0, %v247_v12, -inf  ;;  %v726_v38 = vsel %vm279_vm0, %v248_v17, -inf }
  0x87   :  { %v728_v39 = vsel %vm279_vm0, %v249_v18, -inf  ;;  %v730_v40 = vsel %vm279_vm0, %v250_v19, -inf  ;;  %v256_v41 = vld [vmem:[#allocation2 + $0x1d2] sm:$0x3]  ;;  %v257_v42 = vld [vmem:[#allocation2 + $0x1d4] sm:$0x3]  ;;  %v725_v44 = vmax.f32 %v717_v32, %v724_v37  ;;  %v727_v45 = vmax.f32 %v719_v33, %v726_v38 }
  0x88   :  { %v258_v43 = vld [vmem:[#allocation2 + $0x1d6] sm:$0x3]  ;;  %v729_v46 = vmax.f32 %v721_v34, %v728_v39  ;;  %v731_v47 = vmax.f32 %v723_v35, %v730_v40  ;;  %v259_v48 = vld [vmem:[#allocation2 + $0x1d8] sm:$0x3]  ;;  %v732_v49 = vsel %vm279_vm0, %v251_v24, -inf  ;;  %v734_v50 = vsel %vm279_vm0, %v252_v29, -inf }
  0x89   :  { %v736_v51 = vsel %vm279_vm0, %v253_v30, -inf  ;;  %v738_v52 = vsel %vm279_vm0, %v254_v31, -inf  ;;  %v260_v53 = vld [vmem:[#allocation2 + $0x1da] sm:$0x3]  ;;  %v261_v54 = vld [vmem:[#allocation2 + $0x1dc] sm:$0x3]  ;;  %v733_v56 = vmax.f32 %v725_v44, %v732_v49  ;;  %v735_v57 = vmax.f32 %v727_v45, %v734_v50 }
  0x8a   :  { %v262_v55 = vld [vmem:[#allocation2 + $0x1de] sm:$0x3]  ;;  %v737_v58 = vmax.f32 %v729_v46, %v736_v51  ;;  %v739_v59 = vmax.f32 %v731_v47, %v738_v52  ;;  %v263_v60 = vld [vmem:[#allocation2 + $0x1e0] sm:$0x3]  ;;  %v740_v61 = vsel %vm279_vm0, %v255_v36, -inf  ;;  %v742_v62 = vsel %vm279_vm0, %v256_v41, -inf }
  0x8b   :  { %v744_v63 = vsel %vm279_vm0, %v257_v42, -inf  ;;  %v746_v0 = vsel %vm279_vm0, %v258_v43, -inf  ;;  %v264_v1 = vld [vmem:[#allocation2 + $0x1e2] sm:$0x3]  ;;  %v265_v2 = vld [vmem:[#allocation2 + $0x1e4] sm:$0x3]  ;;  %v741_v4 = vmax.f32 %v733_v56, %v740_v61  ;;  %v743_v5 = vmax.f32 %v735_v57, %v742_v62 }
  0x8c   :  { %v266_v3 = vld [vmem:[#allocation2 + $0x1e6] sm:$0x3]  ;;  %v745_v6 = vmax.f32 %v737_v58, %v744_v63  ;;  %v747_v7 = vmax.f32 %v739_v59, %v746_v0  ;;  %v267_v8 = vld [vmem:[#allocation2 + $0x1e8] sm:$0x3]  ;;  %v748_v9 = vsel %vm279_vm0, %v259_v48, -inf  ;;  %v750_v10 = vsel %vm279_vm0, %v260_v53, -inf }
  0x8d   :  { %v752_v11 = vsel %vm279_vm0, %v261_v54, -inf  ;;  %v754_v12 = vsel %vm279_vm0, %v262_v55, -inf  ;;  %v268_v13 = vld [vmem:[#allocation2 + $0x1ea] sm:$0x3]  ;;  %v269_v14 = vld [vmem:[#allocation2 + $0x1ec] sm:$0x3]  ;;  %v749_v16 = vmax.f32 %v741_v4, %v748_v9  ;;  %v751_v17 = vmax.f32 %v743_v5, %v750_v10 }
  0x8e   :  { %v270_v15 = vld [vmem:[#allocation2 + $0x1ee] sm:$0x3]  ;;  %v753_v18 = vmax.f32 %v745_v6, %v752_v11  ;;  %v755_v19 = vmax.f32 %v747_v7, %v754_v12  ;;  %v271_v20 = vld [vmem:[#allocation2 + $0x1f0] sm:$0x3]  ;;  %v756_v21 = vsel %vm279_vm0, %v263_v60, -inf  ;;  %v758_v22 = vsel %vm279_vm0, %v264_v1, -inf }
  0x8f   :  { %v760_v23 = vsel %vm279_vm0, %v265_v2, -inf  ;;  %v762_v24 = vsel %vm279_vm0, %v266_v3, -inf  ;;  %v272_v25 = vld [vmem:[#allocation2 + $0x1f2] sm:$0x3]  ;;  %v273_v26 = vld [vmem:[#allocation2 + $0x1f4] sm:$0x3]  ;;  %v757_v28 = vmax.f32 %v749_v16, %v756_v21  ;;  %v759_v29 = vmax.f32 %v751_v17, %v758_v22 }
  0x90   :  { %v274_v27 = vld [vmem:[#allocation2 + $0x1f6] sm:$0x3]  ;;  %v761_v30 = vmax.f32 %v753_v18, %v760_v23  ;;  %v763_v31 = vmax.f32 %v755_v19, %v762_v24  ;;  %v275_v32 = vld [vmem:[#allocation2 + $0x1f8] sm:$0x3]  ;;  %v764_v33 = vsel %vm279_vm0, %v267_v8, -inf  ;;  %v766_v34 = vsel %vm279_vm0, %v268_v13, -inf }
  0x91   :  { %v768_v35 = vsel %vm279_vm0, %v269_v14, -inf  ;;  %v770_v36 = vsel %vm279_vm0, %v270_v15, -inf  ;;  %v276_v37 = vld [vmem:[#allocation2 + $0x1fa] sm:$0x3]  ;;  %v277_v38 = vld [vmem:[#allocation2 + $0x1fc] sm:$0x3]  ;;  %v765_v40 = vmax.f32 %v757_v28, %v764_v33  ;;  %v767_v41 = vmax.f32 %v759_v29, %v766_v34 }
  0x92   :  { %v278_v39 = vld [vmem:[#allocation2 + $0x1fe] sm:$0x3]  ;;  %v769_v42 = vmax.f32 %v761_v30, %v768_v35  ;;  %v771_v43 = vmax.f32 %v763_v31, %v770_v36  ;;  %v772_v44 = vsel %vm279_vm0, %v271_v20, -inf  ;;  %v774_v45 = vsel %vm279_vm0, %v272_v25, -inf  ;;  %s809_s20 = sshll.u32 %s873_s0, 4  ;;  %s810_s20 = int_to_ptr.vmem [resolvable:$true] %s809_s20 }
  0x93   :  { %v776_v46 = vsel %vm279_vm0, %v273_v26, -inf  ;;  %v778_v47 = vsel %vm279_vm0, %v274_v27, -inf  ;;  %v773_v48 = vmax.f32 %v765_v40, %v772_v44  ;;  %v775_v49 = vmax.f32 %v767_v41, %v774_v45  ;;  %s844_s21 = scalar_lea.vmem %s810_s20, 32  ;;  %p849_p9 = scmp.lt.s32.totalorder %s810_s20, %s810_s20 }
  0x94   :  { %v777_v50 = vmax.f32 %v769_v42, %v776_v46  ;;  %v779_v51 = vmax.f32 %v771_v43, %v778_v47  ;;  %v780_v52 = vsel %vm279_vm0, %v275_v32, -inf  ;;  %v782_v53 = vsel %vm279_vm0, %v276_v37, -inf  ;;  %p845_p8 = scmp.ne.s32.totalorder %s810_s20, %s844_s21  ;;  %p850_p10 = scmp.lt.s32.totalorder %s844_s21, %s844_s21 }
  0x95   :  { %v784_v54 = vsel %vm279_vm0, %v277_v38, -inf  ;;  %v786_v55 = vsel %vm279_vm0, %v278_v39, -inf  ;;  %v781_v56 = vmax.f32 %v773_v48, %v780_v52  ;;  %v783_v57 = vmax.f32 %v775_v49, %v782_v53 }
  0x96   :  { %v785_v58 = vmax.f32 %v777_v50, %v784_v54  ;;  %v787_v59 = vmax.f32 %v779_v51, %v786_v55  ;;  %p851_p11 = por %p850_p10, %p849_p9 }
  0x97   :  { %v788_v60 = vmax.f32 %v781_v56, %v783_v57 }
  0x98   :  { %v789_v61 = vmax.f32 %v785_v58, %v787_v59  ;;  %p852_p12 = pnand %p851_p11, %p845_p8 }
  0x9a   :  { %v790_v62 = vmax.f32 %v788_v60, %v789_v61 }
  0x9c   :  { %795 = vst [vmem:[#allocation5] sm:$0x3] %v790_v62 }
  0x9d   :  { %855 = shalt.err (!%p852_p12)
}
  0x9e   :  { %s856_s24 = scalar_lea.hbm %s1165_s1, 32 }
  0x9f   :  { %p857_p13 = scmp.ne.s32.totalorder %s1165_s1, %s856_s24  ;;  %p860_p0 = scmp.lt.u32.totalorder %s856_s24, %s1165_s1 }
  0xa1   :  { %p862_p1 = pnand %p860_p0, %p857_p13 }
  0xa3   :  { %865 = shalt.err (!%p862_p1)
}
  0xa4   :  { %812 = dma.vmem_to_hbm [thread:$0]  %s810_s20, 32, %s1165_s1, [#allocation4]  }
  0xa5   :  { %868 = dma.done.wait [#allocation4], 32  }
  0xa6   :  { %869 = vsyncadd [#allocation4], 4294967264 }
  0xa7   :  { %816 = vsyncpa [#allocation3], 1 }
  0xa8   :  { %817 = vsyncpa [#allocation4], 1 }

</bundles_post_ra>
